<compile_context>
chip_gen: v7x
topology: tpu7x:2x2x1
jax: 0.10.0
libtpu: 0.0.40
codegen_flags: <defaults>
</compile_context>

<pallas_src>
import functools

import jax
import jax.numpy as jnp
from jax.experimental import pallas as pl
from jax.experimental.pallas import tpu as pltpu


def _round_up(x, m):
    return (x + m - 1) // m * m


def _pad2(a, rows, cols):
    pr, pc = rows - a.shape[0], cols - a.shape[1]
    if pr == 0 and pc == 0:
        return a
    return jnp.pad(a, ((0, pr), (0, pc)))


def _pad1(a, size):
    p = size - a.shape[0]
    return a if p == 0 else jnp.pad(a, (0, p))


def _single_buffer_supported():
    """Feature-detect BlockSpec(pipeline_mode=pl.Buffered(1)) at import time."""
    if not hasattr(pl, "Buffered"):
        return False
    try:
        pl.BlockSpec((8, 128), lambda i: (0, 0), pipeline_mode=pl.Buffered(1))
        return True
    except TypeError:
        return False


_SINGLE_BUFFER_WEIGHTS = _single_buffer_supported()


def mlp_kernel(x_ref, w1_ref, b1_ref, w2_ref, b2_ref, o_ref, *, d_in, feat_padded):
    """One (TM, D_pad) token tile: pre-LN -> Linear -> ReLU -> Linear -> +residual.

    LayerNorm affine (gamma/beta) is pre-folded into w1/b1 by the wrapper.
    Weights arrive already transposed: w1_ref (D_in_pad, H_pad), w2_ref (H_pad, D_out_pad).
    """
    x = x_ref[...]                                   # (TM, D_in_pad)
    x_f32 = x.astype(jnp.float32)

    # --- pre-LayerNorm (eps = 1e-5, PyTorch default) over the *true* feature dim.
    inv_d = jnp.float32(1.0 / d_in)
    mean = jnp.sum(x_f32, axis=-1, keepdims=True) * inv_d       # padded cols are 0 -> sum exact
    xc = x_f32 - mean
    if feat_padded:
        # Centered two-pass variance; exclude padded columns (where xc == -mean, not 0).
        col = jax.lax.broadcasted_iota(jnp.int32, xc.shape, 1)
        xc_valid = jnp.where(col < d_in, xc, 0.0)
    else:
        xc_valid = xc
    var = jnp.sum(xc_valid * xc_valid, axis=-1, keepdims=True) * inv_d
    xn = xc * jax.lax.rsqrt(var + 1e-5)
    # Padded feature columns of xn may be nonzero, but the corresponding rows of w1 are zero,
    # so they contribute nothing to the matmul.

    # --- layer1: Linear(D_in -> H) + ReLU, canonical (M,K)x(K,N) MXU contraction.
    xn = xn.astype(w1_ref.dtype)
    h = jnp.dot(xn, w1_ref[...], preferred_element_type=jnp.float32)
    h = jnp.maximum(h + b1_ref[...], 0.0)

    # --- layer2: Linear(H -> D_out).
    h = h.astype(w2_ref.dtype)
    y = jnp.dot(h, w2_ref[...], preferred_element_type=jnp.float32)

    # Dropout(p=0.1) is identity in eval mode.
    # --- residual (D_in == D_out); added in f32, then cast to output dtype.
    y = y + b2_ref[...] + x_f32
    o_ref[...] = y.astype(o_ref.dtype)


def mlp_pallas(x, w1, b1, w2, b2, gamma, beta, *, block_rows=512):
    """Fused pre-LN residual MLP.

    x: (..., D_in). Weights use PyTorch nn.Linear layout: w1 (H, D_in), w2 (D_out, H).
    gamma/beta: LayerNorm affine parameters of shape (D_in,).
    """
    orig_shape = x.shape
    d_in = orig_shape[-1]
    hidden, w1_in = w1.shape
    d_out, w2_h = w2.shape
    assert w1_in == d_in and w2_h == hidden, "weight shapes must match nn.Linear layout"
    assert d_in == d_out, "residual=True requires input_dim == output_dim"

    # --- Fold the LayerNorm affine into layer-1 (exact; done in f32):
    #   (xn*gamma + beta) @ w1.T + b1  ==  xn @ (w1*gamma).T + (b1 + w1 @ beta)
    w1_f32 = w1.astype(jnp.float32)
    w1_eff = (w1_f32 * gamma.astype(jnp.float32)[None, :]).astype(w1.dtype)
    b1_eff = (b1.astype(jnp.float32) + w1_f32 @ beta.astype(jnp.float32)).astype(jnp.float32)

    # --- One-time transpose to canonical (K, N) layout for the MXU weight-stationary path.
    w1_t = w1_eff.T                                  # (D_in, H)
    w2_t = w2.T                                      # (H, D_out)

    x2d = x.reshape(-1, d_in)
    n = x2d.shape[0]

    # Lane-dense feature padding (multiples of 128); token tile rounded to the sublane multiple.
    d_in_p = _round_up(d_in, 128)
    h_p = _round_up(hidden, 128)
    d_out_p = _round_up(d_out, 128)
    sub = 16 if x.dtype == jnp.bfloat16 else 8
    if n <= block_rows:
        tm = _round_up(max(n, sub), sub)
        n_p = tm
    else:
        tm = _round_up(block_rows, 256)
        n_p = _round_up(n, tm)

    # Zero-copy when already aligned: only pad dims that actually need it.
    x_p = _pad2(x2d, n_p, d_in_p)
    w1_p = _pad2(w1_t, d_in_p, h_p)
    w2_p = _pad2(w2_t, h_p, d_out_p)
    b1_p = _pad1(b1_eff, h_p).reshape(1, h_p)
    b2_p = _pad1(b2.astype(jnp.float32), d_out_p).reshape(1, d_out_p)

    # --- VMEM budget computed from actual sizes (weights single/double-buffered as built).
    x_item = jnp.dtype(x.dtype).itemsize
    w_item = jnp.dtype(w1.dtype).itemsize
    wbuf = 1 if _SINGLE_BUFFER_WEIGHTS else 2
    weight_bytes = (w1_p.size + w2_p.size) * w_item * wbuf + (b1_p.size + b2_p.size) * 4 * wbuf
    stream_bytes = 2 * tm * (d_in_p + d_out_p) * x_item          # double-buffered x / out tiles
    scratch_bytes = tm * (d_in_p + h_p + d_out_p) * 4            # f32 intermediates
    vmem_limit = weight_bytes + stream_bytes + scratch_bytes + (8 << 20)
    vmem_limit = int(min(max(vmem_limit, 16 << 20), 100 << 20))

    flops = 2 * n_p * d_in_p * h_p + 2 * n_p * h_p * d_out_p
    bytes_accessed = int(
        sum(a.size * a.dtype.itemsize for a in (x_p, w1_p, w2_p, b1_p, b2_p))
        + n_p * d_out_p * x_item
    )

    resident_kwargs = dict(pipeline_mode=pl.Buffered(1)) if _SINGLE_BUFFER_WEIGHTS else {}

    def resident(shape):
        return pl.BlockSpec(shape, lambda i: (0,) * len(shape), **resident_kwargs)

    kernel = functools.partial(mlp_kernel, d_in=d_in, feat_padded=(d_in_p != d_in))

    out = pl.pallas_call(
        kernel,
        out_shape=jax.ShapeDtypeStruct((n_p, d_out_p), x.dtype),
        grid=(n_p // tm,),
        in_specs=[
            pl.BlockSpec((tm, d_in_p), lambda i: (i, 0)),        # x tile (streamed / pipelined)
            resident((d_in_p, h_p)),                             # w1^T (resident)
            resident((1, h_p)),                                  # b1 (affine-folded)
            resident((h_p, d_out_p)),                            # w2^T (resident)
            resident((1, d_out_p)),                              # b2
        ],
        out_specs=pl.BlockSpec((tm, d_out_p), lambda i: (i, 0)),
        compiler_params=pltpu.CompilerParams(
            dimension_semantics=("parallel",),                   # shard token tiles across TCs
            vmem_limit_bytes=vmem_limit,
        ),
        cost_estimate=pl.CostEstimate(
            flops=flops,
            transcendentals=n_p,
            bytes_accessed=bytes_accessed,
        ),
    )(x_p, w1_p, b1_p, w2_p, b2_p)

    if n_p != n or d_out_p != d_out:
        out = out[:n, :d_out]
    return out.reshape(*orig_shape[:-1], d_out)


def mlp_reference(x, w1, b1, w2, b2, gamma, beta):
    xf = x.astype(jnp.float32)
    mean = jnp.mean(xf, axis=-1, keepdims=True)
    var = jnp.mean((xf - mean) ** 2, axis=-1, keepdims=True)
    xn = (xf - mean) * jax.lax.rsqrt(var + 1e-5) * gamma + beta
    h = jnp.maximum(xn @ w1.T + b1, 0.0)
    y = h @ w2.T + b2
    return (y + xf).astype(x.dtype)


if __name__ == "__main__":
    key = jax.random.PRNGKey(0)
    batch, seq = 2, 8
    input_dim, hidden_dim, output_dim = 32, 64, 32   # residual requires in == out

    ks = jax.random.split(key, 7)
    # deterministic init mimicking PyTorch Linear (uniform in +-1/sqrt(fan_in))
    bound1 = 1.0 / (input_dim ** 0.5)
    bound2 = 1.0 / (hidden_dim ** 0.5)
    w1 = jax.random.uniform(ks[0], (hidden_dim, input_dim), jnp.float32, -bound1, bound1)
    b1 = jax.random.uniform(ks[1], (hidden_dim,), jnp.float32, -bound1, bound1)
    w2 = jax.random.uniform(ks[2], (output_dim, hidden_dim), jnp.float32, -bound2, bound2)
    b2 = jax.random.uniform(ks[3], (output_dim,), jnp.float32, -bound2, bound2)
    # non-trivial LayerNorm affine to exercise the gamma/beta fold
    gamma = 1.0 + 0.1 * jax.random.normal(ks[5], (input_dim,), jnp.float32)
    beta = 0.05 * jax.random.normal(ks[6], (input_dim,), jnp.float32)

    x = jax.random.normal(ks[4], (batch, seq, input_dim), jnp.float32)

    out = mlp_pallas(x, w1, b1, w2, b2, gamma, beta)
    out = jax.block_until_ready(out)

    ref = mlp_reference(x, w1, b1, w2, b2, gamma, beta)
    assert out.shape == (batch, seq, output_dim)
    err = float(jnp.max(jnp.abs(out.astype(jnp.float32) - ref.astype(jnp.float32))))
    assert jnp.allclose(out, ref, atol=1e-4, rtol=1e-4), f"max abs err = {err}"

    print("KERNEL_OK")
</pallas_src>

<mosaic_0001>
module attributes {stable_mosaic.version = 11 : i64} {
  func.func @mlp_kernel(%arg0: i32, %arg1: memref<16x128xf32, #tpu.memory_space<vmem>>, %arg2: memref<128x128xf32, #tpu.memory_space<vmem>>, %arg3: memref<1x128xf32, #tpu.memory_space<vmem>>, %arg4: memref<128x128xf32, #tpu.memory_space<vmem>>, %arg5: memref<1x128xf32, #tpu.memory_space<vmem>>, %arg6: memref<16x128xf32, #tpu.memory_space<vmem>>) attributes {dimension_semantics = [#tpu.dimension_semantics<parallel>], iteration_bounds = array<i64: 1>, scalar_prefetch = 0 : i64, scratch_operands = 0 : i64, tpu.core_type = #tpu.core_type<tc>, window_params = [{transform_indices = @transform_0, window_bounds = array<i64: 16, 128>}, {pipeline_mode = #tpu.pipeline_mode<synchronous>, transform_indices = @transform_1, window_bounds = array<i64: 128, 128>}, {pipeline_mode = #tpu.pipeline_mode<synchronous>, transform_indices = @transform_2, window_bounds = array<i64: 1, 128>}, {pipeline_mode = #tpu.pipeline_mode<synchronous>, transform_indices = @transform_3, window_bounds = array<i64: 128, 128>}, {pipeline_mode = #tpu.pipeline_mode<synchronous>, transform_indices = @transform_4, window_bounds = array<i64: 1, 128>}, {transform_indices = @transform_5, window_bounds = array<i64: 16, 128>}]} {
    %c0 = arith.constant 0 : index
    %c0_0 = arith.constant 0 : index
    %0 = vector.load %arg1[%c0, %c0_0] : memref<16x128xf32, #tpu.memory_space<vmem>>, vector<16x128xf32>
    %cst = arith.constant dense<0.000000e+00> : vector<16xf32>
    %1 = vector.multi_reduction <add>, %0, %cst [1] : vector<16x128xf32> to vector<16xf32>
    %2 = vector.shape_cast %1 : vector<16xf32> to vector<16x1xf32>
    %cst_1 = arith.constant 3.125000e-02 : f32
    %3 = vector.broadcast %cst_1 : f32 to vector<16x1xf32>
    %4 = arith.mulf %2, %3 : vector<16x1xf32>
    %5 = vector.broadcast %4 : vector<16x1xf32> to vector<16x128xf32>
    %6 = arith.subf %0, %5 : vector<16x128xf32>
    %7 = tpu.iota {dimensions = array<i32: 1>} : vector<16x128xi32>
    %c32_i32 = arith.constant 32 : i32
    %8 = vector.broadcast %c32_i32 : i32 to vector<16x128xi32>
    %9 = arith.cmpi slt, %7, %8 : vector<16x128xi32>
    %cst_2 = arith.constant 0.000000e+00 : f32
    %10 = vector.broadcast %cst_2 : f32 to vector<16x128xf32>
    %11 = arith.select %9, %6, %10 : vector<16x128xi1>, vector<16x128xf32>
    %12 = arith.mulf %11, %11 : vector<16x128xf32>
    %cst_3 = arith.constant dense<0.000000e+00> : vector<16xf32>
    %13 = vector.multi_reduction <add>, %12, %cst_3 [1] : vector<16x128xf32> to vector<16xf32>
    %14 = vector.shape_cast %13 : vector<16xf32> to vector<16x1xf32>
    %cst_4 = arith.constant 3.125000e-02 : f32
    %15 = vector.broadcast %cst_4 : f32 to vector<16x1xf32>
    %16 = arith.mulf %14, %15 : vector<16x1xf32>
    %cst_5 = arith.constant 9.99999974E-6 : f32
    %17 = vector.broadcast %cst_5 : f32 to vector<16x1xf32>
    %18 = arith.addf %16, %17 : vector<16x1xf32>
    %19 = math.rsqrt %18 : vector<16x1xf32>
    %20 = vector.broadcast %19 : vector<16x1xf32> to vector<16x128xf32>
    %21 = arith.mulf %6, %20 : vector<16x128xf32>
    %c0_6 = arith.constant 0 : index
    %c0_7 = arith.constant 0 : index
    %22 = vector.load %arg2[%c0_6, %c0_7] : memref<128x128xf32, #tpu.memory_space<vmem>>, vector<128x128xf32>
    %cst_8 = arith.constant dense<0.000000e+00> : vector<16x128xf32>
    %23 = tpu.matmul %21, %22, %cst_8 {dimension_numbers = #tpu.dot_dimension_numbers<[1], [0], [0], [1], [0, 0, 1, 1], [], []>} : vector<16x128xf32>, vector<128x128xf32>, vector<16x128xf32> -> vector<16x128xf32>
    %c0_9 = arith.constant 0 : index
    %c0_10 = arith.constant 0 : index
    %24 = vector.load %arg3[%c0_9, %c0_10] : memref<1x128xf32, #tpu.memory_space<vmem>>, vector<1x128xf32>
    %25 = vector.broadcast %24 : vector<1x128xf32> to vector<16x128xf32>
    %26 = arith.addf %23, %25 : vector<16x128xf32>
    %cst_11 = arith.constant 0.000000e+00 : f32
    %27 = vector.broadcast %cst_11 : f32 to vector<16x128xf32>
    %28 = arith.maximumf %26, %27 : vector<16x128xf32>
    %c0_12 = arith.constant 0 : index
    %c0_13 = arith.constant 0 : index
    %29 = vector.load %arg4[%c0_12, %c0_13] : memref<128x128xf32, #tpu.memory_space<vmem>>, vector<128x128xf32>
    %cst_14 = arith.constant dense<0.000000e+00> : vector<16x128xf32>
    %30 = tpu.matmul %28, %29, %cst_14 {dimension_numbers = #tpu.dot_dimension_numbers<[1], [0], [0], [1], [0, 0, 1, 1], [], []>} : vector<16x128xf32>, vector<128x128xf32>, vector<16x128xf32> -> vector<16x128xf32>
    %c0_15 = arith.constant 0 : index
    %c0_16 = arith.constant 0 : index
    %31 = vector.load %arg5[%c0_15, %c0_16] : memref<1x128xf32, #tpu.memory_space<vmem>>, vector<1x128xf32>
    %32 = vector.broadcast %31 : vector<1x128xf32> to vector<16x128xf32>
    %33 = arith.addf %30, %32 : vector<16x128xf32>
    %34 = arith.addf %33, %0 : vector<16x128xf32>
    %c0_17 = arith.constant 0 : index
    %c0_18 = arith.constant 0 : index
    %35 = vector.load %arg6[%c0_17, %c0_18] : memref<16x128xf32, #tpu.memory_space<vmem>>, vector<16x128xf32>
    tpu.vector_store %arg6[%c0_17, %c0_18], %34 {strides = array<i32>} : memref<16x128xf32, #tpu.memory_space<vmem>>, vector<16x128xf32>,
    return
  }
  func.func @transform_0(%arg0: i32) -> (i32, i32) {
    %c0_i32 = arith.constant 0 : i32
    %c0_i32_0 = arith.constant 0 : i32
    return %arg0, %c0_i32 : i32, i32
  }
  func.func @transform_1(%arg0: i32) -> (i32, i32) {
    %c0_i32 = arith.constant 0 : i32
    %c0_i32_0 = arith.constant 0 : i32
    %c0_i32_1 = arith.constant 0 : i32
    return %c0_i32, %c0_i32_0 : i32, i32
  }
  func.func @transform_2(%arg0: i32) -> (i32, i32) {
    %c0_i32 = arith.constant 0 : i32
    %c0_i32_0 = arith.constant 0 : i32
    %c0_i32_1 = arith.constant 0 : i32
    return %c0_i32, %c0_i32_0 : i32, i32
  }
  func.func @transform_3(%arg0: i32) -> (i32, i32) {
    %c0_i32 = arith.constant 0 : i32
    %c0_i32_0 = arith.constant 0 : i32
    %c0_i32_1 = arith.constant 0 : i32
    return %c0_i32, %c0_i32_0 : i32, i32
  }
  func.func @transform_4(%arg0: i32) -> (i32, i32) {
    %c0_i32 = arith.constant 0 : i32
    %c0_i32_0 = arith.constant 0 : i32
    %c0_i32_1 = arith.constant 0 : i32
    return %c0_i32, %c0_i32_0 : i32, i32
  }
  func.func @transform_5(%arg0: i32) -> (i32, i32) {
    %c0_i32 = arith.constant 0 : i32
    %c0_i32_0 = arith.constant 0 : i32
    return %arg0, %c0_i32 : i32, i32
  }
}

</mosaic_0001>

<bundles_post_ra>
// kernel: tpu_custom_call.1
= control target key start
LH: loop header
LB: loop body
LE: loop exit
PB: predicated region body
PF: predicated region fallthrough
CT: control target
= control target key end

     0   :  { %10 = vsyncpa [#allocation3], 0  ;;  %s714_s0 = inlined_call_operand.hbm [shape: f32[16,128], index: 0, kind: input, shape index: {}]   ;;  %s715_s1 = inlined_call_operand.hbm [shape: f32[128,128], index: 1, kind: input, shape index: {}]   ;;  %s716_s2 = inlined_call_operand.vmem [shape: f32[1,128], index: 2, kind: input, shape index: {}]   ;;  %s717_s3 = inlined_call_operand.hbm [shape: f32[128,128], index: 3, kind: input, shape index: {}]   ;;  %s718_s4 = inlined_call_operand.vmem [shape: f32[1,128], index: 4, kind: input, shape index: {}]   ;;  %s719_s5 = inlined_call_operand.hbm [shape: f32[16,128], index: 5, kind: output, shape index: {}]  }
   0x1   :  { %11 = vsyncpa [#allocation6], 0 }
   0x2   :  { %12 = vsyncpa [#allocation4], 0  ;;  %s587_s18 = smov [#allocation5]   ;;  %s588_s20 = smov [#allocation2]  }
   0x3   :  { %s30_s19 = sshll.u32 %s587_s18, 4  ;;  %s18_s21 = sshll.u32 %s588_s20, 4  ;;  %s31_s19 = int_to_ptr.vmem [resolvable:$true] %s30_s19  ;;  %s623_s21 = int_to_ptr.vmem [resolvable:$true] %s18_s21 }
   0x4   :  { %s493_s24 = scalar_lea.hbm %s715_s1, 2048 }
   0x5   :  { %p494_p0 = scmp.ne.s32.totalorder %s715_s1, %s493_s24  ;;  %p497_p1 = scmp.lt.u32.totalorder %s493_s24, %s715_s1 }
   0x7   :  { %p499_p2 = pnand %p497_p1, %p494_p0 }
   0x9   :  { %502 = shalt.err (!%p499_p2)
}
   0xa   :  { %s503_s29 = scalar_lea.vmem %s31_s19, 2048  ;;  %p508_p4 = scmp.lt.s32.totalorder %s31_s19, %s31_s19 }
   0xb   :  { %p504_p3 = scmp.ne.s32.totalorder %s31_s19, %s503_s29  ;;  %p509_p5 = scmp.lt.s32.totalorder %s503_s29, %s503_s29 }
   0xd   :  { %p510_p6 = por %p509_p5, %p508_p4 }
   0xf   :  { %p511_p7 = pnand %p510_p6, %p504_p3 }
  0x11   :  { %514 = shalt.err (!%p511_p7)
}
  0x12   :  { %s589_s30 = smov 128   ;;  %s590_s6 = smov 8  }
  0x13   :  { %36 = dma.hbm_to_vmem [thread:$0]  %s715_s1, 2048, %s31_s19, [#allocation6], %s589_s30, %s589_s30, %s590_s6  }
  0x14   :  { %s515_s11 = scalar_lea.hbm %s714_s0, 256 }
  0x15   :  { %p516_p8 = scmp.ne.s32.totalorder %s714_s0, %s515_s11  ;;  %p519_p9 = scmp.lt.u32.totalorder %s515_s11, %s714_s0 }
  0x17   :  { %p521_p10 = pnand %p519_p9, %p516_p8 }
  0x19   :  { %524 = shalt.err (!%p521_p10)
}
  0x1a   :  { %s525_s16 = scalar_lea.vmem %s623_s21, 256  ;;  %p530_p12 = scmp.lt.s32.totalorder %s623_s21, %s623_s21 }
  0x1b   :  { %p526_p11 = scmp.ne.s32.totalorder %s623_s21, %s525_s16  ;;  %p531_p13 = scmp.lt.s32.totalorder %s525_s16, %s525_s16 }
  0x1d   :  { %p532_p0 = por %p531_p13, %p530_p12 }
  0x1f   :  { %p533_p1 = pnand %p532_p0, %p526_p11 }
  0x21   :  { %536 = shalt.err (!%p533_p1)
}
  0x22   :  { %24 = dma.hbm_to_vmem [thread:$0]  %s714_s0, 256, %s623_s21, [#allocation3], %s589_s30, %s589_s30, %s590_s6  }
  0x23   :  { %s591_s18 = smov [#allocation7]   ;;  %s537_s23 = scalar_lea.hbm %s717_s3, 2048 }
  0x24   :  { %s44_s19 = sshll.u32 %s591_s18, 4  ;;  %p538_p2 = scmp.ne.s32.totalorder %s717_s3, %s537_s23  ;;  %s45_s19 = int_to_ptr.vmem [resolvable:$true] %s44_s19 }
  0x25   :  { %p541_p3 = scmp.lt.u32.totalorder %s537_s23, %s717_s3 }
  0x27   :  { %p543_p4 = pnand %p541_p3, %p538_p2 }
  0x29   :  { %546 = shalt.err (!%p543_p4)
}
  0x2a   :  { %s547_s28 = scalar_lea.vmem %s45_s19, 2048  ;;  %p552_p6 = scmp.lt.s32.totalorder %s45_s19, %s45_s19 }
  0x2b   :  { %p548_p5 = scmp.ne.s32.totalorder %s45_s19, %s547_s28  ;;  %p553_p7 = scmp.lt.s32.totalorder %s547_s28, %s547_s28 }
  0x2d   :  { %p554_p8 = por %p553_p7, %p552_p6 }
  0x2f   :  { %p555_p9 = pnand %p554_p8, %p548_p5 }
  0x31   :  { %558 = shalt.err (!%p555_p9)
}
  0x32   :  { %50 = dma.hbm_to_vmem [thread:$0]  %s717_s3, 2048, %s45_s19, [#allocation6], %s589_s30, %s589_s30, %s590_s6  }
  0x33   :  { %581 = dma.done.wait [#allocation3], 256  }
  0x34   :  { %582 = vsyncadd [#allocation3], 4294967040 }
  0x35   :  { %583 = dma.done.wait [#allocation6], 4096  }
  0x36   :  { %584 = vsyncadd [#allocation6], 4294963200  ;;  %v675_v0 = vld [vmem:[#allocation2] sm:$0xff]  ;;  %v678_v1 = vld [vmem:[#allocation2 + $0x8] sm:$0xff]  ;;  %v72_v11 = vlaneseq  ;;  %s592_s9 = smov [#allocation8]  }
  0x37   :  { %64 = vadd.xlane.f32.xlu0 %v675_v0  ;;  %v91_v2 = vld [vmem:[#allocation5] sm:$0xff]  ;;  %v92_v3 = vld [vmem:[#allocation5 + $0x8] sm:$0xff]  ;;  %v93_v4 = vld [vmem:[#allocation5 + $0x10] sm:$0xff]  ;;  %s298_s10 = sshll.u32 %s592_s9, 4  ;;  %s299_s10 = int_to_ptr.vmem [resolvable:$true] %s298_s10 }
  0x38   :  { %v419_v5 = vpack.c.bf16 %v92_v3, %v91_v2  ;;  %v94_v6 = vld [vmem:[#allocation5 + $0x18] sm:$0xff]  ;;  %v95_v8 = vld [vmem:[#allocation5 + $0x20] sm:$0xff]  ;;  %v96_v9 = vld [vmem:[#allocation5 + $0x28] sm:$0xff]  ;;  %v73_v12 = vand.u32 127, %v72_v11  ;;  %p564_p11 = scmp.lt.s32.totalorder %s299_s10, %s299_s10 }
  0x39   :  { %v423_v7 = vpack.c.bf16 %v94_v6, %v93_v4  ;;  %v427_v10 = vpack.c.bf16 %v96_v9, %v95_v8  ;;  %v97_v23 = vld [vmem:[#allocation5 + $0x30] sm:$0xff]  ;;  %v98_v24 = vld [vmem:[#allocation5 + $0x38] sm:$0xff]  ;;  %v99_v26 = vld [vmem:[#allocation5 + $0x40] sm:$0xff] }
  0x3a   :  { %420 = vmatprep.subr.bf16.mxu0 %v419_v5  ;;  %vm74_vm0 = vcmp.lt.s32.totalorder %v73_v12, 32  ;;  %v431_v25 = vpack.c.bf16 %v98_v24, %v97_v23  ;;  %v100_v27 = vld [vmem:[#allocation5 + $0x48] sm:$0xff]  ;;  %v101_v29 = vld [vmem:[#allocation5 + $0x50] sm:$0xff]  ;;  %v102_v30 = vld [vmem:[#allocation5 + $0x58] sm:$0xff] }
  0x3b   :  { %66 = vadd.xlane.f32.xlu0 %v678_v1  ;;  %422 = vmatpush3.bf16.msra.mxu0 %v419_v5  ;;  %v435_v28 = vpack.c.bf16 %v100_v27, %v99_v26  ;;  %v439_v31 = vpack.c.bf16 %v102_v30, %v101_v29  ;;  %v103_v32 = vld [vmem:[#allocation5 + $0x60] sm:$0xff]  ;;  %v104_v33 = vld [vmem:[#allocation5 + $0x68] sm:$0xff]  ;;  %v105_v34 = vld [vmem:[#allocation5 + $0x70] sm:$0xff] }
  0x3c   :  { %424 = vmatprep.subr.bf16.mxu0 %v423_v7  ;;  %v443_v35 = vpack.c.bf16 %v104_v33, %v103_v32  ;;  %v106_v36 = vld [vmem:[#allocation5 + $0x78] sm:$0xff]  ;;  %v191_v38 = vld [vmem:[#allocation7] sm:$0xff]  ;;  %v192_v39 = vld [vmem:[#allocation7 + $0x8] sm:$0xff] }
  0x3d   :  { %v447_v37 = vpack.c.bf16 %v106_v36, %v105_v34  ;;  %v193_v40 = vld [vmem:[#allocation7 + $0x10] sm:$0xff]  ;;  %v451_v41 = vpack.c.bf16 %v192_v39, %v191_v38  ;;  %v194_v42 = vld [vmem:[#allocation7 + $0x18] sm:$0xff]  ;;  %v195_v44 = vld [vmem:[#allocation7 + $0x20] sm:$0xff] }
  0x3e   :  { %v455_v43 = vpack.c.bf16 %v194_v42, %v193_v40  ;;  %v196_v45 = vld [vmem:[#allocation7 + $0x28] sm:$0xff]  ;;  %v197_v47 = vld [vmem:[#allocation7 + $0x30] sm:$0xff]  ;;  %v198_v48 = vld [vmem:[#allocation7 + $0x38] sm:$0xff] }
  0x3f   :  { %426 = vmatpush3.bf16.msra.mxu0 %v423_v7  ;;  %452 = vmatprep.subr.bf16.mxu1 %v451_v41  ;;  %v459_v46 = vpack.c.bf16 %v196_v45, %v195_v44  ;;  %v463_v49 = vpack.c.bf16 %v198_v48, %v197_v47  ;;  %v199_v50 = vld [vmem:[#allocation7 + $0x40] sm:$0xff]  ;;  %v200_v51 = vld [vmem:[#allocation7 + $0x48] sm:$0xff]  ;;  %v201_v53 = vld [vmem:[#allocation7 + $0x50] sm:$0xff] }
  0x40   :  { %428 = vmatprep.subr.bf16.mxu0 %v427_v10  ;;  %454 = vmatpush3.bf16.msra.mxu1 %v451_v41  ;;  %v467_v52 = vpack.c.bf16 %v200_v51, %v199_v50  ;;  %v202_v54 = vld [vmem:[#allocation7 + $0x58] sm:$0xff]  ;;  %v203_v56 = vld [vmem:[#allocation7 + $0x60] sm:$0xff]  ;;  %v204_v57 = vld [vmem:[#allocation7 + $0x68] sm:$0xff] }
  0x41   :  { %456 = vmatprep.subr.bf16.mxu1 %v455_v43  ;;  %v471_v55 = vpack.c.bf16 %v202_v54, %v201_v53  ;;  %v475_v58 = vpack.c.bf16 %v204_v57, %v203_v56  ;;  %v205_v7 = vld [vmem:[#allocation7 + $0x70] sm:$0xff]  ;;  %v206_v8 = vld [vmem:[#allocation7 + $0x78] sm:$0xff] }
  0x42   :  { %v479_v9 = vpack.c.bf16 %v206_v8, %v205_v7 }
  0x43   :  { %430 = vmatpush3.bf16.msra.mxu0 %v427_v10  ;;  %v311_v10 = vld [vmem:[%s716_s2] ss:$0 sm:$0xff]  ;;  %s559_s2 = scalar_lea.vmem %s299_s10, 256 }
  0x44   :  { %432 = vmatprep.subr.bf16.mxu0 %v431_v25  ;;  %458 = vmatpush3.bf16.msra.mxu1 %v455_v43  ;;  %p560_p10 = scmp.ne.s32.totalorder %s299_s10, %s559_s2  ;;  %p565_p12 = scmp.lt.s32.totalorder %s559_s2, %s559_s2 }
  0x45   :  { %460 = vmatprep.subr.bf16.mxu1 %v459_v46 }
  0x46   :  { %p566_p13 = por %p565_p12, %p564_p11 }
  0x47   :  { %434 = vmatpush3.bf16.msra.mxu0 %v431_v25 }
  0x48   :  { %436 = vmatprep.subr.bf16.mxu0 %v435_v28  ;;  %462 = vmatpush3.bf16.msra.mxu1 %v459_v46  ;;  %p567_p0 = pnand %p566_p13, %p560_p10 }
  0x49   :  { %464 = vmatprep.subr.bf16.mxu1 %v463_v49 }
  0x4b   :  { %438 = vmatpush3.bf16.msra.mxu0 %v435_v28 }
  0x4c   :  { %440 = vmatprep.subr.bf16.mxu0 %v439_v31  ;;  %466 = vmatpush3.bf16.msra.mxu1 %v463_v49 }
  0x4d   :  { %468 = vmatprep.subr.bf16.mxu1 %v467_v52 }
  0x4f   :  { %442 = vmatpush3.bf16.msra.mxu0 %v439_v31 }
  0x50   :  { %444 = vmatprep.subr.bf16.mxu0 %v443_v35  ;;  %470 = vmatpush3.bf16.msra.mxu1 %v467_v52 }
  0x51   :  { %472 = vmatprep.subr.bf16.mxu1 %v471_v55 }
  0x53   :  { %446 = vmatpush3.bf16.msra.mxu0 %v443_v35 }
  0x54   :  { %448 = vmatprep.subr.bf16.mxu0 %v447_v37  ;;  %474 = vmatpush3.bf16.msra.mxu1 %v471_v55 }
  0x55   :  { %476 = vmatprep.subr.bf16.mxu1 %v475_v58 }
  0x57   :  { %450 = vmatpush3.bf16.msra.mxu0 %v447_v37 }
  0x58   :  { %478 = vmatpush3.bf16.msra.mxu1 %v475_v58 }
  0x59   :  { %480 = vmatprep.subr.bf16.mxu1 %v479_v9 }
  0x5c   :  { %482 = vmatpush3.bf16.msra.mxu1 %v479_v9 }
  0xc4   :  { %v65_v13 = vpop.xlane.xlu0 %64 }
  0xc5   :  { %v68_v14 = vmul.f32 0.03125, %v65_v13 }
  0xc7   :  { %v682_v15 = vsub.f32 %v675_v0, %v68_v14 }
  0xc8   :  { %v67_v16 = vpop.xlane.xlu0 %66 }
  0xc9   :  { %v69_v17 = vmul.f32 0.03125, %v67_v16  ;;  %v75_v18 = vsel %vm74_vm0, %v682_v15, 0.0 }
  0xca   :  { %v77_v19 = vmul.f32 %v75_v18, %v75_v18 }
  0xcb   :  { %v686_v20 = vsub.f32 %v678_v1, %v69_v17  ;;  %v312_v17 = vld [vmem:[%s718_s4] ss:$0 sm:$0xff] }
  0xcc   :  { %79 = vadd.xlane.f32.xlu1 %v77_v19 }
  0xcd   :  { %v76_v21 = vsel %vm74_vm0, %v686_v20, 0.0 }
  0xce   :  { %v78_v22 = vmul.f32 %v76_v21, %v76_v21 }
  0xd0   :  { %81 = vadd.xlane.f32.xlu1 %v78_v22 }
 0x159   :  { %v80_v59 = vpop.xlane.xlu1 %79 }
 0x15a   :  { %v83_v60 = vmul.f32 0.03125, %v80_v59 }
 0x15c   :  { %v85_v61 = vadd.f32 1e-05, %v83_v60 }
 0x15d   :  { %v82_v62 = vpop.xlane.xlu1 %81 }
 0x15e   :  { %489 = vrsqrt.f32 %v85_v61  ;;  %v84_v63 = vmul.f32 0.03125, %v82_v62 }
 0x160   :  { %v86_v2 = vadd.f32 1e-05, %v84_v63 }
 0x162   :  { %491 = vrsqrt.f32 %v86_v2 }
 0x168   :  { %v490_v3 = vpop.eup %489 }
 0x169   :  { %v89_v4 = vmul.f32 %v490_v3, %v682_v15 }
 0x16b   :  { %381 = vmatprep.mubr.f32.mxu0 %v89_v4 }
 0x16c   :  { %v492_v5 = vpop.eup %491 }
 0x16d   :  { %v90_v6 = vmul.f32 %v492_v5, %v686_v20 }
 0x16f   :  { %382 = vmatmul.mubr.f32.vlgmr.msra.gmra.mrb[0].mxu0 %v90_v6 }
 0x242   :  { %v383_v11 = vpop.f32.mrb[0].mxu0 }
 0x243   :  { %v186_v12 = vadd.f32 %v383_v11, %v311_v10  ;;  %v180_v13 = vpop.f32.mrb[1].mxu0 }
 0x244   :  { %v181_v14 = vadd.f32 %v311_v10, %v180_v13 }
 0x245   :  { %v190_v15 = vmax.f32 %v186_v12, 0.0 }
 0x246   :  { %v189_v16 = vmax.f32 %v181_v14, 0.0 }
 0x248   :  { %416 = vmatprep.mubr.f32.mxu1 %v189_v16 }
 0x249   :  { %417 = vmatmul.mubr.f32.vlgmr.msra.gmra.mrb[0].mxu1 %v190_v15 }
 0x31c   :  { %v418_v18 = vpop.f32.mrb[0].mxu1 }
 0x31d   :  { %v286_v19 = vadd.f32 %v418_v18, %v312_v17  ;;  %v280_v20 = vpop.f32.mrb[1].mxu1 }
 0x31e   :  { %v281_v21 = vadd.f32 %v312_v17, %v280_v20 }
 0x31f   :  { %v290_v22 = vadd.f32 %v286_v19, %v678_v1 }
 0x320   :  { %v289_v23 = vadd.f32 %v281_v21, %v675_v0 }
 0x321   :  { %292 = vst [vmem:[#allocation8 + $0x8] sm:$0xff] %v290_v22 }
 0x322   :  { %291 = vst [vmem:[#allocation8] sm:$0xff] %v289_v23 }
 0x323   :  { %570 = shalt.err (!%p567_p0)
}
 0x324   :  { %s571_s12 = scalar_lea.hbm %s719_s5, 256 }
 0x325   :  { %p572_p1 = scmp.ne.s32.totalorder %s719_s5, %s571_s12  ;;  %p575_p2 = scmp.lt.u32.totalorder %s571_s12, %s719_s5 }
 0x327   :  { %p577_p3 = pnand %p575_p2, %p572_p1 }
 0x329   :  { %580 = shalt.err (!%p577_p3)
}
 0x32a   :  { %304 = dma.vmem_to_hbm [thread:$0]  %s299_s10, 256, %s719_s5, [#allocation4], %s589_s30, %s589_s30, %s590_s6  }
 0x32b   :  { %585 = dma.done.wait [#allocation4], 256  }
 0x32c   :  { %586 = vsyncadd [#allocation4], 4294967040 }
 0x32d   :  { %308 = vsyncpa [#allocation3], 1 }
 0x32e   :  { %309 = vsyncpa [#allocation6], 1 }
 0x32f   :  { %310 = vsyncpa [#allocation4], 1 }

</bundles_post_ra>
